<compile_context>
chip_gen: v5e
topology: v5e:2x2
jax: 0.10.0
libtpu: 0.0.40
codegen_flags: <defaults>
</compile_context>

<pallas_src>
import jax
import jax.numpy as jnp
from jax import lax
from jax.experimental import pallas as pl
from jax.experimental.pallas import tpu as pltpu

BN_EPS = 1e-5


# ---------------------------------------------------------------------------
# Fused kernel.
#   x_ref   : (TN, 1200)  batch tile of the raw input, cols = c*400 + h*20 + w
#   w_ref   : (1360, 128) bf16 packed weights:
#               rows [   0:1200) conv1 block-diagonal weight (BN folded)
#               rows [1200:1328) conv2 block weight   (cols >= 32 zero)
#               rows [1328:1360) pool+fc weight       (cols >= 10 zero)
#   b_ref   : (8, 128) f32 packed biases: row0 = b1_eff, row1 = b2, row2 = bf
#   out_ref : (TN, 10)   log-probabilities
# ---------------------------------------------------------------------------
def _fused_simple_cnn_kernel(x_ref, w_ref, b_ref, out_ref):
    # conv1 (5x5, stride 5) with BatchNorm folded into the weights: one MXU
    # matmul; output lanes are (oh, ow, cout) lane-dense.
    xb = x_ref[...].astype(jnp.bfloat16)                              # (TN, 1200)
    h1 = jnp.dot(xb, w_ref[0:1200, :], preferred_element_type=jnp.float32)
    h1 = jnp.maximum(h1 + b_ref[0:1, :], 0.0)                         # (TN, 128) f32

    # conv2 (3x3) as ONE matmul against a block-structured (128,32) weight.
    y2 = jnp.dot(h1.astype(jnp.bfloat16), w_ref[1200:1328, :],
                 preferred_element_type=jnp.float32)
    y2 = jnp.maximum(y2 + b_ref[1:2, :], 0.0)                         # (TN, 128); lanes>=32 are 0

    # avg_pool2d(2) + flatten + Linear(8,10) folded into one (32,10) matmul
    # (0.25 pool scale pre-multiplied into the weight slab).
    logits = jnp.dot(y2[:, 0:32].astype(jnp.bfloat16), w_ref[1328:1360, :],
                     preferred_element_type=jnp.float32) + b_ref[2:3, :]  # (TN, 128)

    # log_softmax over the 10 valid lanes.
    col = lax.broadcasted_iota(jnp.int32, logits.shape, 1)
    valid = col < 10
    m = jnp.max(jnp.where(valid, logits, -1e30), axis=1, keepdims=True)
    e = jnp.where(valid, jnp.exp(logits - m), 0.0)
    lse = m + jnp.log(jnp.sum(e, axis=1, keepdims=True))
    out_ref[...] = (logits - lse)[:, 0:10]


def _pack_params(params, mean, var):
    """Fold BN into conv1 and build the block-structured weight/bias slabs."""
    scale = params["gamma"] * lax.rsqrt(var + BN_EPS)                 # (3,)
    shift = params["beta"] - mean * scale                             # (3,)

    # conv1 as a block-diagonal (1200,128) matrix acting on the flat (c,h,w) row.
    # row = c*400 + (5*oh+kh)*20 + (5*ow+kw), col = (oh*4+ow)*8 + cout
    w1t = params["w1"].transpose(1, 2, 3, 0).astype(jnp.float32)      # (c,kh,kw,cout)
    eye4 = jnp.eye(4, dtype=jnp.float32)
    w1_big = jnp.einsum("chwo,ab,de->cahdwbeo", w1t, eye4, eye4).reshape(1200, 128)
    row_c = jnp.arange(1200) // 400                                   # input channel per row
    w1_eff = w1_big * scale[row_c][:, None]                           # BN scale folded
    b1_eff = jnp.tile(params["b1"], 16) + shift[row_c] @ w1_big       # BN shift folded (128,)

    # conv2 (3x3 VALID on the 4x4x8 map) as a (128,32) matrix,
    # rows = (oh,ow,cin), cols = (p,q,cout).
    a4 = jnp.arange(4)
    p2 = jnp.arange(2)
    k3 = jnp.arange(3)
    sel = (a4[:, None, None] == (p2[None, :, None] + k3[None, None, :])).astype(jnp.float32)
    w2_big = jnp.einsum("aph,bqw,oihw->abipqo", sel, sel,
                        params["w2"].astype(jnp.float32)).reshape(128, 32)
    b2_t = jnp.tile(params["b2"], 4)                                  # (32,)

    # avg_pool(2x2) + flatten + Linear folded: (p,q,cout) -> 10 logits.
    wf_big = 0.25 * jnp.tile(params["wf"].T.astype(jnp.float32), (4, 1))   # (32,10)

    w_slab = jnp.zeros((1360, 128), jnp.float32)
    w_slab = w_slab.at[0:1200, :].set(w1_eff)
    w_slab = w_slab.at[1200:1328, 0:32].set(w2_big)
    w_slab = w_slab.at[1328:1360, 0:10].set(wf_big)
    w_slab = w_slab.astype(jnp.bfloat16)                              # native MXU dtype

    b_slab = jnp.zeros((8, 128), jnp.float32)
    b_slab = b_slab.at[0, :].set(b1_eff)
    b_slab = b_slab.at[1, 0:32].set(b2_t)
    b_slab = b_slab.at[2, 0:10].set(params["bf"])
    return w_slab, b_slab


def simple_cnn_forward(x, params):
    N, C, H, W = x.shape
    assert (C, H, W) == (3, 20, 20), "SimpleCNN requires 3x20x20 inputs"

    # BatchNorm2d training-mode batch statistics, hoisted out of the kernel and
    # folded into the conv1 weights (numerically stable two-pass mean/var).
    # TODO(synk): BatchNorm running_mean/running_var buffer updates (a training
    # side effect) are not reproduced; only the forward normalization is.
    mean = jnp.mean(x, axis=(0, 2, 3))
    var = jnp.var(x, axis=(0, 2, 3))          # biased, as in PyTorch training mode
    w_slab, b_slab = _pack_params(params, mean, var)

    xr = x.reshape(N, 1200)                   # free contiguous view of NCHW (no im2col)

    # Batch tiling: whole batch in one block when small, otherwise 256-row tiles
    # (auto double-buffered DMA; remainder blocks rely on Pallas boundary masking).
    TN = N if N <= 256 else 256
    grid = (pl.cdiv(N, TN),)

    out = pl.pallas_call(
        _fused_simple_cnn_kernel,
        out_shape=jax.ShapeDtypeStruct((N, 10), jnp.float32),
        grid_spec=pltpu.PrefetchScalarGridSpec(
            num_scalar_prefetch=0,
            grid=grid,
            in_specs=[
                pl.BlockSpec((TN, 1200), lambda i: (i, 0)),   # batch tile of x
                pl.BlockSpec((1360, 128), lambda i: (0, 0)),  # packed weights (resident)
                pl.BlockSpec((8, 128), lambda i: (0, 0)),     # packed biases  (resident)
            ],
            out_specs=pl.BlockSpec((TN, 10), lambda i: (i, 0)),
        ),
        compiler_params=pltpu.CompilerParams(
            dimension_semantics=("parallel",),   # v7x: shard batch tiles over both TCs
        ),
    )(xr, w_slab, b_slab)

    return {"preds": out}


# ---- pure-JAX reference for a correctness smoke test ------------------------------
def _reference(x, params):
    mean = jnp.mean(x, axis=(0, 2, 3))
    var = jnp.var(x, axis=(0, 2, 3))               # biased, as in training-mode BN
    xbn = (x - mean[None, :, None, None]) * lax.rsqrt(var + BN_EPS)[None, :, None, None]
    xbn = xbn * params["gamma"][None, :, None, None] + params["beta"][None, :, None, None]
    y1 = lax.conv_general_dilated(
        xbn, params["w1"], (5, 5), "VALID", dimension_numbers=("NCHW", "OIHW", "NCHW")
    ) + params["b1"][None, :, None, None]
    y1 = jnp.maximum(y1, 0.0)
    y2 = lax.conv_general_dilated(
        y1, params["w2"], (1, 1), "VALID", dimension_numbers=("NCHW", "OIHW", "NCHW")
    ) + params["b2"][None, :, None, None]
    y2 = jnp.maximum(y2, 0.0)
    pooled = jnp.mean(y2, axis=(2, 3))             # avg_pool2d(2) on 2x2 -> flatten
    logits = pooled @ params["wf"].T + params["bf"]
    return jax.nn.log_softmax(logits, axis=1)


if __name__ == "__main__":
    key = jax.random.PRNGKey(0)
    ks = jax.random.split(key, 9)
    x = jax.random.normal(ks[0], (2, 3, 20, 20), jnp.float32)
    params = {
        "gamma": 1.0 + 0.1 * jax.random.normal(ks[1], (3,), jnp.float32),
        "beta": 0.1 * jax.random.normal(ks[2], (3,), jnp.float32),
        "w1": 0.1 * jax.random.normal(ks[3], (8, 3, 5, 5), jnp.float32),
        "b1": 0.1 * jax.random.normal(ks[4], (8,), jnp.float32),
        "w2": 0.1 * jax.random.normal(ks[5], (8, 8, 3, 3), jnp.float32),
        "b2": 0.1 * jax.random.normal(ks[6], (8,), jnp.float32),
        "wf": 0.1 * jax.random.normal(ks[7], (10, 8), jnp.float32),
        "bf": 0.1 * jax.random.normal(ks[8], (10,), jnp.float32),
    }

    out = jax.jit(simple_cnn_forward)(x, params)
    preds = jax.block_until_ready(out["preds"])
    assert preds.shape == (2, 10) and preds.dtype == jnp.float32

    ref = _reference(x, params)
    # tolerance covers bf16 MXU operands vs f32 XLA convs
    assert jnp.allclose(preds, ref, atol=2e-2, rtol=2e-2), "mismatch vs reference"
    print("KERNEL_OK")
</pallas_src>

<mosaic_0001>
module attributes {stable_mosaic.version = 11 : i64} {
  func.func @_fused_simple_cnn_kernel(%arg0: i32, %arg1: memref<2x1200xf32, #tpu.memory_space<vmem>>, %arg2: memref<1360x128xbf16, #tpu.memory_space<vmem>>, %arg3: memref<8x128xf32, #tpu.memory_space<vmem>>, %arg4: memref<2x10xf32, #tpu.memory_space<vmem>>) attributes {dimension_semantics = [#tpu.dimension_semantics<parallel>], iteration_bounds = array<i64: 1>, scalar_prefetch = 0 : i64, scratch_operands = 0 : i64, tpu.core_type = #tpu.core_type<tc>, window_params = [{transform_indices = @transform_0, window_bounds = array<i64: 2, 1200>}, {pipeline_mode = #tpu.pipeline_mode<synchronous>, transform_indices = @transform_1, window_bounds = array<i64: 1360, 128>}, {pipeline_mode = #tpu.pipeline_mode<synchronous>, transform_indices = @transform_2, window_bounds = array<i64: 8, 128>}, {transform_indices = @transform_3, window_bounds = array<i64: 2, 10>}]} {
    %c0 = arith.constant 0 : index
    %c0_0 = arith.constant 0 : index
    %0 = vector.load %arg1[%c0, %c0_0] : memref<2x1200xf32, #tpu.memory_space<vmem>>, vector<2x1200xf32>
    %1 = arith.truncf %0 : vector<2x1200xf32> to vector<2x1200xbf16>
    %c0_1 = arith.constant 0 : index
    %c0_2 = arith.constant 0 : index
    %2 = vector.load %arg2[%c0_1, %c0_2] : memref<1360x128xbf16, #tpu.memory_space<vmem>>, vector<1200x128xbf16>
    %cst = arith.constant dense<0.000000e+00> : vector<2x128xf32>
    %3 = tpu.matmul %1, %2, %cst {dimension_numbers = #tpu.dot_dimension_numbers<[1], [0], [0], [1], [0, 0, 1, 1], [], []>} : vector<2x1200xbf16>, vector<1200x128xbf16>, vector<2x128xf32> -> vector<2x128xf32>
    %c0_3 = arith.constant 0 : index
    %c0_4 = arith.constant 0 : index
    %4 = vector.load %arg3[%c0_3, %c0_4] : memref<8x128xf32, #tpu.memory_space<vmem>>, vector<1x128xf32>
    %5 = vector.broadcast %4 : vector<1x128xf32> to vector<2x128xf32>
    %6 = arith.addf %3, %5 : vector<2x128xf32>
    %cst_5 = arith.constant 0.000000e+00 : f32
    %7 = vector.broadcast %cst_5 : f32 to vector<2x128xf32>
    %8 = arith.maximumf %6, %7 : vector<2x128xf32>
    %9 = arith.truncf %8 : vector<2x128xf32> to vector<2x128xbf16>
    %c1200 = arith.constant 1200 : index
    %c0_6 = arith.constant 0 : index
    %10 = vector.load %arg2[%c1200, %c0_6] : memref<1360x128xbf16, #tpu.memory_space<vmem>>, vector<128x128xbf16>
    %cst_7 = arith.constant dense<0.000000e+00> : vector<2x128xf32>
    %11 = tpu.matmul %9, %10, %cst_7 {dimension_numbers = #tpu.dot_dimension_numbers<[1], [0], [0], [1], [0, 0, 1, 1], [], []>} : vector<2x128xbf16>, vector<128x128xbf16>, vector<2x128xf32> -> vector<2x128xf32>
    %c1 = arith.constant 1 : index
    %c0_8 = arith.constant 0 : index
    %12 = vector.load %arg3[%c1, %c0_8] : memref<8x128xf32, #tpu.memory_space<vmem>>, vector<1x128xf32>
    %13 = vector.broadcast %12 : vector<1x128xf32> to vector<2x128xf32>
    %14 = arith.addf %11, %13 : vector<2x128xf32>
    %cst_9 = arith.constant 0.000000e+00 : f32
    %15 = vector.broadcast %cst_9 : f32 to vector<2x128xf32>
    %16 = arith.maximumf %14, %15 : vector<2x128xf32>
    %17 = vector.extract_strided_slice %16 {offsets = [0, 0], sizes = [2, 32], strides = [1, 1]} : vector<2x128xf32> to vector<2x32xf32>
    %18 = arith.truncf %17 : vector<2x32xf32> to vector<2x32xbf16>
    %c1328 = arith.constant 1328 : index
    %c0_10 = arith.constant 0 : index
    %19 = vector.load %arg2[%c1328, %c0_10] : memref<1360x128xbf16, #tpu.memory_space<vmem>>, vector<32x128xbf16>
    %cst_11 = arith.constant dense<0.000000e+00> : vector<2x128xf32>
    %20 = tpu.matmul %18, %19, %cst_11 {dimension_numbers = #tpu.dot_dimension_numbers<[1], [0], [0], [1], [0, 0, 1, 1], [], []>} : vector<2x32xbf16>, vector<32x128xbf16>, vector<2x128xf32> -> vector<2x128xf32>
    %c2 = arith.constant 2 : index
    %c0_12 = arith.constant 0 : index
    %21 = vector.load %arg3[%c2, %c0_12] : memref<8x128xf32, #tpu.memory_space<vmem>>, vector<1x128xf32>
    %22 = vector.broadcast %21 : vector<1x128xf32> to vector<2x128xf32>
    %23 = arith.addf %20, %22 : vector<2x128xf32>
    %24 = tpu.iota {dimensions = array<i32: 1>} : vector<2x128xi32>
    %c10_i32 = arith.constant 10 : i32
    %25 = vector.broadcast %c10_i32 : i32 to vector<2x128xi32>
    %26 = arith.cmpi slt, %24, %25 : vector<2x128xi32>
    %cst_13 = arith.constant -1.000000e+30 : f32
    %27 = vector.broadcast %cst_13 : f32 to vector<2x128xf32>
    %28 = arith.select %26, %23, %27 : vector<2x128xi1>, vector<2x128xf32>
    %cst_14 = arith.constant dense<0xFF800000> : vector<2xf32>
    %29 = vector.multi_reduction <maximumf>, %28, %cst_14 [1] : vector<2x128xf32> to vector<2xf32>
    %30 = vector.shape_cast %29 : vector<2xf32> to vector<2x1xf32>
    %31 = vector.broadcast %30 : vector<2x1xf32> to vector<2x128xf32>
    %32 = arith.subf %23, %31 : vector<2x128xf32>
    %33 = math.exp %32 : vector<2x128xf32>
    %cst_15 = arith.constant 0.000000e+00 : f32
    %34 = vector.broadcast %cst_15 : f32 to vector<2x128xf32>
    %35 = arith.select %26, %33, %34 : vector<2x128xi1>, vector<2x128xf32>
    %cst_16 = arith.constant dense<0.000000e+00> : vector<2xf32>
    %36 = vector.multi_reduction <add>, %35, %cst_16 [1] : vector<2x128xf32> to vector<2xf32>
    %37 = vector.shape_cast %36 : vector<2xf32> to vector<2x1xf32>
    %38 = math.log %37 : vector<2x1xf32>
    %39 = arith.addf %30, %38 : vector<2x1xf32>
    %40 = vector.broadcast %39 : vector<2x1xf32> to vector<2x128xf32>
    %41 = arith.subf %23, %40 : vector<2x128xf32>
    %42 = vector.extract_strided_slice %41 {offsets = [0, 0], sizes = [2, 10], strides = [1, 1]} : vector<2x128xf32> to vector<2x10xf32>
    %c0_17 = arith.constant 0 : index
    %c0_18 = arith.constant 0 : index
    %43 = vector.load %arg4[%c0_17, %c0_18] : memref<2x10xf32, #tpu.memory_space<vmem>>, vector<2x10xf32>
    tpu.vector_store %arg4[%c0_17, %c0_18], %42 {strides = array<i32>} : memref<2x10xf32, #tpu.memory_space<vmem>>, vector<2x10xf32>,
    return
  }
  func.func @transform_0(%arg0: i32) -> (i32, i32) {
    %c0_i32 = arith.constant 0 : i32
    %c0_i32_0 = arith.constant 0 : i32
    return %arg0, %c0_i32 : i32, i32
  }
  func.func @transform_1(%arg0: i32) -> (i32, i32) {
    %c0_i32 = arith.constant 0 : i32
    %c0_i32_0 = arith.constant 0 : i32
    %c0_i32_1 = arith.constant 0 : i32
    return %c0_i32, %c0_i32_0 : i32, i32
  }
  func.func @transform_2(%arg0: i32) -> (i32, i32) {
    %c0_i32 = arith.constant 0 : i32
    %c0_i32_0 = arith.constant 0 : i32
    %c0_i32_1 = arith.constant 0 : i32
    return %c0_i32, %c0_i32_0 : i32, i32
  }
  func.func @transform_3(%arg0: i32) -> (i32, i32) {
    %c0_i32 = arith.constant 0 : i32
    %c0_i32_0 = arith.constant 0 : i32
    return %arg0, %c0_i32 : i32, i32
  }
}

</mosaic_0001>

<bundles_post_ra>
// kernel: tile.18
= control target key start
LH: loop header
LB: loop body
LE: loop exit
PB: predicated region body
PF: predicated region fallthrough
CT: control target
= control target key end

     0   :  { %s28_s0 = inlined_call_operand.vmem [shape: f32[8], index: 0, kind: input, shape index: {}]   ;;  %s29_s1 = inlined_call_operand.vmem [shape: f32[16,8], index: 1, kind: output, shape index: {}]  }
   0x1   :  { %v4_v0 = vld [vmem:[%s28_s0] ss:$0 sm:$0xff] }
   0x2   :  { %5 = vst [vmem:[%s29_s1] sm:$0xff] %v4_v0 }
   0x3   :  { %8 = vst [vmem:[%s29_s1 + $0x8] sm:$0xff] %v4_v0 }

// kernel: tile.23
= control target key start
LH: loop header
LB: loop body
LE: loop exit
PB: predicated region body
PF: predicated region fallthrough
CT: control target
= control target key end

     0   :  { %s22_s0 = inlined_call_operand.vmem [shape: f32[8], index: 0, kind: input, shape index: {}]   ;;  %s23_s1 = inlined_call_operand.vmem [shape: f32[4,8], index: 1, kind: output, shape index: {}]  }
   0x1   :  { %v4_v0 = vld [vmem:[%s22_s0] ss:$0 sm:$0xff] }
   0x2   :  { %5 = vst [vmem:[%s23_s1] sm:$0xf] %v4_v0 }

// kernel: simple_cnn_forward.1
= control target key start
LH: loop header
LB: loop body
LE: loop exit
PB: predicated region body
PF: predicated region fallthrough
CT: control target
= control target key end

     0   :  { %s1705_s0 = inlined_call_operand.vmem [shape: f32[2,1200], index: 0, kind: input, shape index: {}]   ;;  %s1706_s1 = inlined_call_operand.vmem [shape: bf16[1360,128], index: 1, kind: input, shape index: {}]   ;;  %s1707_s2 = inlined_call_operand.vmem [shape: f32[8,128], index: 2, kind: input, shape index: {}]   ;;  %s1708_s3 = inlined_call_operand.hbm [shape: f32[2,10], index: 3, kind: output, shape index: {}]  }
   0x1   :  { %v1296_v0 = vld [vmem:[%s1706_s1 + $0x38] sm:$0xff]  ;;  %v1295_v4 = vld [vmem:[%s1706_s1 + $0x30] sm:$0xff]  ;;  %v1294_v8 = vld [vmem:[%s1706_s1 + $0x28] sm:$0xff] }
   0x2   :  { %v1312_v1 = vld [vmem:[%s1706_s1 + $0xb8] sm:$0xff]  ;;  %662 = vmatpush.bf16.msra.mxu0 %v1296_v0  ;;  %v1311_v5 = vld [vmem:[%s1706_s1 + $0xb0] sm:$0xff]  ;;  %v1310_v9 = vld [vmem:[%s1706_s1 + $0xa8] sm:$0xff] }
   0x3   :  { %v1320_v2 = vld [vmem:[%s1706_s1 + $0xf8] sm:$0xff]  ;;  %688 = vmatpush.bf16.msra.mxu2 %v1312_v1  ;;  %v1319_v6 = vld [vmem:[%s1706_s1 + $0xf0] sm:$0xff]  ;;  %v1318_v10 = vld [vmem:[%s1706_s1 + $0xe8] sm:$0xff] }
   0x4   :  { %v1304_v3 = vld [vmem:[%s1706_s1 + $0x78] sm:$0xff]  ;;  %701 = vmatpush.bf16.msra.mxu3 %v1320_v2  ;;  %v1303_v7 = vld [vmem:[%s1706_s1 + $0x70] sm:$0xff]  ;;  %v1302_v11 = vld [vmem:[%s1706_s1 + $0x68] sm:$0xff] }
   0x5   :  { %675 = vmatpush.bf16.msra.mxu1 %v1304_v3  ;;  %v1293_v12 = vld [vmem:[%s1706_s1 + $0x20] sm:$0xff]  ;;  %v1292_v16 = vld [vmem:[%s1706_s1 + $0x18] sm:$0xff]  ;;  %v1291_v21 = vld [vmem:[%s1706_s1 + $0x10] sm:$0xff] }
   0x6   :  { %663 = vmatpush.bf16.msra.mxu0 %v1295_v4  ;;  %v1309_v13 = vld [vmem:[%s1706_s1 + $0xa0] sm:$0xff]  ;;  %v1308_v17 = vld [vmem:[%s1706_s1 + $0x98] sm:$0xff]  ;;  %v1307_v22 = vld [vmem:[%s1706_s1 + $0x90] sm:$0xff] }
   0x7   :  { %689 = vmatpush.bf16.msra.mxu2 %v1311_v5  ;;  %v1317_v14 = vld [vmem:[%s1706_s1 + $0xe0] sm:$0xff]  ;;  %v1316_v18 = vld [vmem:[%s1706_s1 + $0xd8] sm:$0xff]  ;;  %v1315_v23 = vld [vmem:[%s1706_s1 + $0xd0] sm:$0xff] }
   0x8   :  { %702 = vmatpush.bf16.msra.mxu3 %v1319_v6  ;;  %v1301_v15 = vld [vmem:[%s1706_s1 + $0x60] sm:$0xff]  ;;  %v1300_v19 = vld [vmem:[%s1706_s1 + $0x58] sm:$0xff]  ;;  %v1299_v24 = vld [vmem:[%s1706_s1 + $0x50] sm:$0xff] }
   0x9   :  { %676 = vmatpush.bf16.msra.mxu1 %v1303_v7  ;;  %v16_v20 = vld [vmem:[%s1705_s0] sm:$0xff] }
   0xa   :  { %664 = vmatpush.bf16.msra.mxu0 %v1294_v8  ;;  %22 = vst [vmem:[#allocation1] ss:$4 sm:$0xff] %v16_v20 }
   0xb   :  { %690 = vmatpush.bf16.msra.mxu2 %v1310_v9 }
   0xc   :  { %703 = vmatpush.bf16.msra.mxu3 %v1318_v10 }
   0xd   :  { %677 = vmatpush.bf16.msra.mxu1 %v1302_v11 }
   0xe   :  { %665 = vmatpush.bf16.msra.mxu0 %v1293_v12 }
   0xf   :  { %691 = vmatpush.bf16.msra.mxu2 %v1309_v13 }
  0x10   :  { %704 = vmatpush.bf16.msra.mxu3 %v1317_v14 }
  0x11   :  { %678 = vmatpush.bf16.msra.mxu1 %v1301_v15 }
  0x12   :  { %666 = vmatpush.bf16.msra.mxu0 %v1292_v16 }
  0x13   :  { %692 = vmatpush.bf16.msra.mxu2 %v1308_v17 }
  0x14   :  { %705 = vmatpush.bf16.msra.mxu3 %v1316_v18 }
  0x15   :  { %679 = vmatpush.bf16.msra.mxu1 %v1300_v19 }
  0x16   :  { %8 = vsyncpa [#allocation3], 0  ;;  %667 = vmatpush.bf16.msra.mxu0 %v1291_v21  ;;  %v1290_v25 = vld [vmem:[%s1706_s1 + $0x8] sm:$0xff]  ;;  %v18_v30 = vld [vmem:[%s1705_s0 + $0x10] sm:$0xf]  ;;  %vm658_vm0 = vcmask 392192  }
  0x17   :  { %693 = vmatpush.bf16.msra.mxu2 %v1307_v22  ;;  %v1306_v26 = vld [vmem:[%s1706_s1 + $0x88] sm:$0xff]  ;;  %v27_v31 = vld.sshfl [vmem:[#allocation1 + $0x10] sm:$0xff pattern:$0x73625140]  ;;  %v1289_v35 = vld [vmem:[%s1706_s1] sm:$0xff]  ;;  %vm893_vm1 = vcmask 261120  }
  0x18   :  { %v17_v27 = vld [vmem:[%s1705_s0 + $0x8] sm:$0xff]  ;;  %706 = vmatpush.bf16.msra.mxu3 %v1315_v23  ;;  %v25_v32 = vld.sshfl [vmem:[#allocation1] sm:$0xff pattern:$0x73625140]  ;;  %v1328_v37 = vld [vmem:[%s1706_s1 + $0x138] sm:$0xff]  ;;  %v48_v43 = vpack.c.bf16 %v27_v31, %v27_v31  ;;  %vm914_vm3 = vcmask 1041408  }
  0x19   :  { %680 = vmatpush.bf16.msra.mxu1 %v1299_v24  ;;  %v1314_v28 = vld [vmem:[%s1706_s1 + $0xc8] sm:$0xff]  ;;  %24 = vst [vmem:[#allocation1 + $0x20] ss:$4 sm:$0xff] %v17_v27  ;;  %v28_v33 = vld.sshfl [vmem:[#allocation1 + $0x18] sm:$0xff pattern:$0x73625140]  ;;  %v46_v44 = vpack.c.bf16 %v25_v32, %v25_v32 }
  0x1a   :  { %v1298_v29 = vld [vmem:[%s1706_s1 + $0x48] sm:$0xff]  ;;  %668 = vmatpush.bf16.msra.mxu0 %v1290_v25  ;;  %v1305_v36 = vld [vmem:[%s1706_s1 + $0x80] sm:$0xff]  ;;  %v1344_v38 = vld [vmem:[%s1706_s1 + $0x1b8] sm:$0xff]  ;;  %v49_v47 = vpack.c.bf16 %v28_v33, %v28_v33  ;;  %s938_s29 = sshll.u32 %s1708_s3, 4  ;;  %vm929_vm4 = vcmask 74752   ;;  %s939_s29 = int_to_ptr.hbm [resolvable:$true] %s938_s29 }
  0x1b   :  { %v26_v34 = vld.sshfl [vmem:[#allocation1 + $0x8] sm:$0xff pattern:$0x73625140]  ;;  %694 = vmatpush.bf16.msra.mxu2 %v1306_v26  ;;  %v1313_v39 = vld [vmem:[%s1706_s1 + $0xc0] sm:$0xff]  ;;  %v1352_v41 = vld [vmem:[%s1706_s1 + $0x1f8] sm:$0xff] }
  0x1c   :  { %33 = vst [vmem:[#allocation1] ss:$4 sm:$0xff] %v18_v30  ;;  %707 = vmatpush.bf16.msra.mxu3 %v1314_v28  ;;  %v1297_v40 = vld [vmem:[%s1706_s1 + $0x40] sm:$0xff]  ;;  %v1336_v42 = vld [vmem:[%s1706_s1 + $0x178] sm:$0xff]  ;;  %v1327_v45 = vld [vmem:[%s1706_s1 + $0x130] sm:$0xff]  ;;  %v47_v48 = vpack.c.bf16 %v26_v34, %v26_v34 }
  0x1d   :  { %681 = vmatpush.bf16.msra.mxu1 %v1298_v29  ;;  %v1343_v46 = vld [vmem:[%s1706_s1 + $0x1b0] sm:$0xff]  ;;  %v1326_v51 = vld [vmem:[%s1706_s1 + $0x128] sm:$0xff]  ;;  %v1325_v55 = vld [vmem:[%s1706_s1 + $0x120] sm:$0xff] }
  0x1e   :  { %669 = vmatpush.bf16.msra.mxu0 %v1289_v35  ;;  %v1351_v49 = vld [vmem:[%s1706_s1 + $0x1f0] sm:$0xff]  ;;  %v1342_v52 = vld [vmem:[%s1706_s1 + $0x1a8] sm:$0xff]  ;;  %v1341_v56 = vld [vmem:[%s1706_s1 + $0x1a0] sm:$0xff] }
  0x1f   :  { %695 = vmatpush.bf16.msra.mxu2 %v1305_v36  ;;  %v1335_v50 = vld [vmem:[%s1706_s1 + $0x170] sm:$0xff]  ;;  %v1350_v53 = vld [vmem:[%s1706_s1 + $0x1e8] sm:$0xff]  ;;  %v1349_v57 = vld [vmem:[%s1706_s1 + $0x1e0] sm:$0xff] }
  0x20   :  { %708 = vmatpush.bf16.msra.mxu3 %v1313_v39  ;;  %v1334_v54 = vld [vmem:[%s1706_s1 + $0x168] sm:$0xff]  ;;  %v1333_v58 = vld [vmem:[%s1706_s1 + $0x160] sm:$0xff]  ;;  %v1324_v59 = vld [vmem:[%s1706_s1 + $0x118] sm:$0xff] }
  0x21   :  { %682 = vmatpush.bf16.msra.mxu1 %v1297_v40  ;;  %670 = vmatmul.bf16.vlgmr.msra.gmra.mxu0 %v46_v44  ;;  %v1340_v60 = vld [vmem:[%s1706_s1 + $0x198] sm:$0xff]  ;;  %v1323_v63 = vld [vmem:[%s1706_s1 + $0x110] sm:$0xff]  ;;  %v1322_v3 = vld [vmem:[%s1706_s1 + $0x108] sm:$0xff] }
  0x22   :  { %714 = vmatpush.bf16.msrb.mxu0 %v1328_v37  ;;  %696 = vmatmul.bf16.vlgmr.msra.gmra.mxu2 %v48_v43  ;;  %v1348_v61 = vld [vmem:[%s1706_s1 + $0x1d8] sm:$0xff]  ;;  %v1339_v0 = vld [vmem:[%s1706_s1 + $0x190] sm:$0xff]  ;;  %v1338_v4 = vld [vmem:[%s1706_s1 + $0x188] sm:$0xff] }
  0x23   :  { %740 = vmatpush.bf16.msrb.mxu2 %v1344_v38  ;;  %709 = vmatmul.bf16.vlgmr.msra.gmra.mxu3 %v49_v47  ;;  %v1332_v62 = vld [vmem:[%s1706_s1 + $0x158] sm:$0xff]  ;;  %v1347_v1 = vld [vmem:[%s1706_s1 + $0x1d0] sm:$0xff]  ;;  %v1346_v5 = vld [vmem:[%s1706_s1 + $0x1c8] sm:$0xff] }
  0x24   :  { %753 = vmatpush.bf16.msrb.mxu3 %v1352_v41  ;;  %683 = vmatmul.bf16.vlgmr.msra.gmra.mxu1 %v47_v48  ;;  %v1331_v2 = vld [vmem:[%s1706_s1 + $0x150] sm:$0xff]  ;;  %v1330_v6 = vld [vmem:[%s1706_s1 + $0x148] sm:$0xff]  ;;  %v1321_v7 = vld [vmem:[%s1706_s1 + $0x100] sm:$0xff] }
  0x25   :  { %727 = vmatpush.bf16.msrb.mxu1 %v1336_v42  ;;  %v1337_v8 = vld [vmem:[%s1706_s1 + $0x180] sm:$0xff]  ;;  %v31_v9 = vld.sshfl [vmem:[#allocation1 + $0x30] sm:$0xff pattern:$0x73625140]  ;;  %v1360_v11 = vld [vmem:[%s1706_s1 + $0x238] sm:$0xff] }
  0x26   :  { %715 = vmatpush.bf16.msrb.mxu0 %v1327_v45  ;;  %v29_v10 = vld.sshfl [vmem:[#allocation1 + $0x20] sm:$0xff pattern:$0x73625140]  ;;  %v32_v14 = vld.sshfl [vmem:[#allocation1 + $0x38] sm:$0xff pattern:$0x73625140]  ;;  %v52_v15 = vpack.c.bf16 %v31_v9, %v31_v9 }
  0x27   :  { %741 = vmatpush.bf16.msrb.mxu2 %v1343_v46  ;;  %v1345_v12 = vld [vmem:[%s1706_s1 + $0x1c0] sm:$0xff]  ;;  %v50_v16 = vpack.c.bf16 %v29_v10, %v29_v10  ;;  %v30_v17 = vld.sshfl [vmem:[#allocation1 + $0x28] sm:$0xff pattern:$0x73625140]  ;;  %v1363_v18 = vld [vmem:[%s1706_s1 + $0x250] sm:$0xff]  ;;  %v53_v20 = vpack.c.bf16 %v32_v14, %v32_v14 }
  0x28   :  { %754 = vmatpush.bf16.msrb.mxu3 %v1351_v49  ;;  %v1329_v13 = vld [vmem:[%s1706_s1 + $0x140] sm:$0xff]  ;;  %v1359_v19 = vld [vmem:[%s1706_s1 + $0x230] sm:$0xff]  ;;  %v51_v21 = vpack.c.bf16 %v30_v17, %v30_v17  ;;  %v1362_v22 = vld [vmem:[%s1706_s1 + $0x248] sm:$0xff] }
  0x29   :  { %728 = vmatpush.bf16.msrb.mxu1 %v1335_v50  ;;  %v1358_v23 = vld [vmem:[%s1706_s1 + $0x228] sm:$0xff]  ;;  %v1361_v24 = vld [vmem:[%s1706_s1 + $0x240] sm:$0xff]  ;;  %v1356_v26 = vld [vmem:[%s1706_s1 + $0x218] sm:$0xff] }
  0x2a   :  { %716 = vmatpush.bf16.msrb.mxu0 %v1326_v51  ;;  %v1357_v25 = vld [vmem:[%s1706_s1 + $0x220] sm:$0xff]  ;;  %v35_v27 = vld.sshfl [vmem:[#allocation1 + $0x8] sm:$0xff pattern:$0x73625140]  ;;  %v1355_v28 = vld [vmem:[%s1706_s1 + $0x210] sm:$0xff] }
  0x2b   :  { %742 = vmatpush.bf16.msrb.mxu2 %v1342_v52  ;;  %v55_v29 = vpack.c.bf16 %v35_v27, %v35_v27  ;;  %v1354_v30 = vld [vmem:[%s1706_s1 + $0x208] sm:$0xff]  ;;  %v1353_v31 = vld [vmem:[%s1706_s1 + $0x200] sm:$0xff]  ;;  %v1371_v35 = vld [vmem:[%s1706_s1 + $0x290] sm:$0xff] }
  0x2c   :  { %755 = vmatpush.bf16.msrb.mxu3 %v1350_v53  ;;  %v34_v32 = vld.sshfl [vmem:[#allocation1] sm:$0xff pattern:$0x73625140]  ;;  %v1370_v37 = vld [vmem:[%s1706_s1 + $0x288] sm:$0xff]  ;;  %v1368_v43 = vld [vmem:[%s1706_s1 + $0x278] sm:$0xff] }
  0x2d   :  { %729 = vmatpush.bf16.msrb.mxu1 %v1334_v54  ;;  %v54_v33 = vpack.c.bf16 %v34_v32, %v34_v32  ;;  %v1369_v39 = vld [vmem:[%s1706_s1 + $0x280] sm:$0xff]  ;;  %v1367_v45 = vld [vmem:[%s1706_s1 + $0x270] sm:$0xff]  ;;  %v1366_v47 = vld [vmem:[%s1706_s1 + $0x268] sm:$0xff] }
  0x2e   :  { %717 = vmatpush.bf16.msrb.mxu0 %v1325_v55  ;;  %v1375_v48 = vld [vmem:[%s1707_s2] ss:$0 sm:$0xff]  ;;  %v1364_v52 = vld [vmem:[%s1706_s1 + $0x258] sm:$0xff] }
  0x2f   :  { %743 = vmatpush.bf16.msrb.mxu2 %v1341_v56  ;;  %v1365_v49 = vld [vmem:[%s1706_s1 + $0x260] sm:$0xff] }
  0x30   :  { %756 = vmatpush.bf16.msrb.mxu3 %v1349_v57  ;;  %v1373_v56 = vld [vmem:[%s1706_s1 + $0x2a0] sm:$0xff] }
  0x31   :  { %730 = vmatpush.bf16.msrb.mxu1 %v1333_v58 }
  0x32   :  { %718 = vmatpush.bf16.msrb.mxu0 %v1324_v59 }
  0x33   :  { %744 = vmatpush.bf16.msrb.mxu2 %v1340_v60  ;;  %v1372_v60 = vld [vmem:[%s1706_s1 + $0x298] sm:$0xff] }
  0x34   :  { %757 = vmatpush.bf16.msrb.mxu3 %v1348_v61 }
  0x35   :  { %731 = vmatpush.bf16.msrb.mxu1 %v1332_v62 }
  0x36   :  { %719 = vmatpush.bf16.msrb.mxu0 %v1323_v63 }
  0x37   :  { %745 = vmatpush.bf16.msrb.mxu2 %v1339_v0 }
  0x38   :  { %758 = vmatpush.bf16.msrb.mxu3 %v1347_v1 }
  0x39   :  { %732 = vmatpush.bf16.msrb.mxu1 %v1331_v2 }
  0x3a   :  { %720 = vmatpush.bf16.msrb.mxu0 %v1322_v3 }
  0x3b   :  { %746 = vmatpush.bf16.msrb.mxu2 %v1338_v4 }
  0x3c   :  { %759 = vmatpush.bf16.msrb.mxu3 %v1346_v5 }
  0x3d   :  { %733 = vmatpush.bf16.msrb.mxu1 %v1330_v6 }
  0x3e   :  { %721 = vmatpush.bf16.msrb.mxu0 %v1321_v7 }
  0x3f   :  { %747 = vmatpush.bf16.msrb.mxu2 %v1337_v8 }
  0x40   :  { %760 = vmatpush.bf16.msrb.mxu3 %v1345_v12 }
  0x41   :  { %734 = vmatpush.bf16.msrb.mxu1 %v1329_v13  ;;  %722 = vmatmul.bf16.vlgmr.msrb.gmra.mxu0 %v50_v16  ;;  %v1376_v13 = vld [vmem:[%s1707_s2 + $0x1] ss:$0 sm:$0xff] }
  0x42   :  { %766 = vmatpush.bf16.msra.mxu0 %v1360_v11  ;;  %748 = vmatmul.bf16.vlgmr.msrb.gmra.mxu2 %v52_v15 }
  0x43   :  { %761 = vmatmul.bf16.vlgmr.msrb.gmra.mxu3 %v53_v20  ;;  %860 = vmatpush.bf16.msra.mxu2 %v1371_v35 }
  0x44   :  { %735 = vmatmul.bf16.vlgmr.msrb.gmra.mxu1 %v51_v21  ;;  %903 = vmatpush.bf16.msra.mxu3 %v1373_v56  ;;  %v1377_v21 = vld [vmem:[%s1707_s2 + $0x2] ss:$0 sm:$0xff]  ;;  %s1408_s2 = smov [#allocation2]  }
  0x45   :  { %784 = vmatpush.bf16.msra.mxu1 %v1363_v18  ;;  %s936_s26 = sshll.u32 %s1408_s2, 4  ;;  %s937_s26 = int_to_ptr.vmem [resolvable:$true] %s936_s26 }
  0x46   :  { %767 = vmatpush.bf16.msra.mxu0 %v1359_v19  ;;  %v910_v19 = vlaneseq }
  0x47   :  { %861 = vmatpush.bf16.msra.mxu2 %v1370_v37 }
  0x48   :  { %904 = vmatpush.bf16.msra.mxu3 %v1372_v60  ;;  %v911_v20 = vand.u32 127, %v910_v19 }
  0x49   :  { %785 = vmatpush.bf16.msra.mxu1 %v1362_v22 }
  0x4a   :  { %768 = vmatpush.bf16.msra.mxu0 %v1358_v23  ;;  %vm912_vm2 = vcmp.lt.s32.totalorder %v911_v20, 10 }
  0x4b   :  { %862 = vmatpush.bf16.msra.mxu2 %v1369_v39 }
  0x4d   :  { %786 = vmatpush.bf16.msra.mxu1 %v1361_v24 }
  0x4e   :  { %769 = vmatpush.bf16.msra.mxu0 %v1357_v25 }
  0x4f   :  { %863 = vmatpush.bf16.msra.mxu2 %v1368_v43 }
  0x52   :  { %770 = vmatpush.bf16.msra.mxu0 %v1356_v26 }
  0x53   :  { %864 = vmatpush.bf16.msra.mxu2 %v1367_v45 }
  0x54   :  { %1247 = vmatmul.msk.bf16.vlgmr.msra.gmra.mxu1 %vm658_vm0, %v55_v29 }
  0x56   :  { %771 = vmatpush.bf16.msra.mxu0 %v1355_v28 }
  0x57   :  { %865 = vmatpush.bf16.msra.mxu2 %v1366_v47 }
  0x5a   :  { %772 = vmatpush.bf16.msra.mxu0 %v1354_v30 }
  0x5b   :  { %866 = vmatpush.bf16.msra.mxu2 %v1365_v49 }
  0x5e   :  { %773 = vmatpush.bf16.msra.mxu0 %v1353_v31 }
  0x5f   :  { %867 = vmatpush.bf16.msra.mxu2 %v1364_v52 }
  0x61   :  { %774 = vmatmul.bf16.vlgmr.msra.gmra.mxu0 %v54_v33 }
  0x9e   :  { %v671_v34 = vpop.f32.mrf.mxu0 }
  0x9f   :  { %v672_v50 = vadd.f32 %v1375_v48, %v671_v34 }
  0xa1   :  { %v684_v36 = vpop.f32.mrf.mxu1 }
  0xa2   :  { %v685_v54 = vadd.f32 %v684_v36, %v672_v50 }
  0xa5   :  { %v697_v38 = vpop.f32.mrf.mxu2 }
  0xa6   :  { %v710_v40 = vpop.f32.mrf.mxu3  ;;  %v673_v41 = vpop.f32.mrf.mxu0  ;;  %v698_v57 = vadd.f32 %v697_v38, %v685_v54 }
  0xa8   :  { %v711_v62 = vadd.f32 %v710_v40, %v698_v57 }
  0xa9   :  { %v686_v42 = vpop.f32.mrf.mxu1 }
  0xad   :  { %v699_v44 = vpop.f32.mrf.mxu2 }
  0xae   :  { %v712_v46 = vpop.f32.mrf.mxu3 }
  0xbe   :  { %v723_v51 = vpop.f32.mrf.mxu0 }
  0xbf   :  { %v724_v0 = vadd.f32 %v723_v51, %v711_v62 }
  0xc1   :  { %v736_v53 = vpop.f32.mrf.mxu1 }
  0xc2   :  { %v737_v3 = vadd.f32 %v736_v53, %v724_v0 }
  0xc5   :  { %v749_v55 = vpop.f32.mrf.mxu2 }
  0xc6   :  { %v762_v58 = vpop.f32.mrf.mxu3  ;;  %v725_v59 = vpop.f32.mrf.mxu0  ;;  %v750_v4 = vadd.f32 %v749_v55, %v737_v3 }
  0xc8   :  { %v763_v6 = vadd.f32 %v762_v58, %v750_v4 }
  0xc9   :  { %v738_v61 = vpop.f32.mrf.mxu1 }
  0xcd   :  { %v751_v63 = vpop.f32.mrf.mxu2 }
  0xce   :  { %v764_v1 = vpop.f32.mrf.mxu3 }
  0xd1   :  { %v788_v2 = vpop.f32.mrf.mxu1 }
  0xd9   :  { %v790_v5 = vpop.f32.mrf.mxu1 }
  0xde   :  { %v775_v7 = vpop.f32.mrf.mxu0 }
  0xdf   :  { %v776_v8 = vadd.f32 %v775_v7, %v763_v6 }
  0xe1   :  { %v789_v9 = vadd.f32 %v788_v2, %v776_v8 }
  0xe3   :  { %v792_v10 = vmax.f32 %v789_v9, 0.0 }
  0xe5   :  { %v793_v11 = vpack.c.bf16 %v792_v10, %v792_v10 }
  0xe6   :  { %v777_v12 = vpop.f32.mrf.mxu0 }
  0xe7   :  { %868 = vmatmul.bf16.vlgmr.msra.gmra.mxu2 %v793_v11 }
 0x16a   :  { %v869_v14 = vpop.f32.mrf.mxu2 }
 0x16b   :  { %v870_v15 = vadd.f32 %v1376_v13, %v869_v14 }
 0x16d   :  { %v873_v16 = vmax.f32 %v870_v15, 0.0 }
 0x16f   :  { %v874_v17 = vpack.c.bf16 %v873_v16, %v873_v16 }
 0x171   :  { %1288 = vmatmul.msk.bf16.vlgmr.msra.gmra.mxu3 %vm893_vm1, %v874_v17 }
 0x172   :  { %v871_v18 = vpop.f32.mrf.mxu2 }
 0x1f4   :  { %v906_v22 = vpop.f32.mrf.mxu3 }
 0x1f5   :  { %v907_v23 = vadd.f32 %v1377_v21, %v906_v22 }
 0x1f7   :  { %v913_v24 = vsel %vm912_vm2, %v907_v23, -1e+30 }
 0x1f8   :  { %v915_v25 = vsel %vm914_vm3, %v913_v24, -inf }
 0x1f9   :  { %916 = vmax.xlane.f32.xlu0 %v915_v25 }
 0x1fc   :  { %v908_v26 = vpop.f32.mrf.mxu3 }
 0x26c   :  { %v917_v27 = vpop.xlane.xlu0 %916 }
 0x26d   :  { %v918_v28 = vsub.f32 %v907_v23, %v917_v27 }
 0x26f   :  { %v919_v29 = vmul.f32 1.442695, %v918_v28 }
 0x271   :  { %1378 = vpow2.f32 %v919_v29 }
 0x277   :  { %v1379_v30 = vpop.eup %1378 }
 0x278   :  { %v921_v31 = vsel %vm912_vm2, %v1379_v30, 0.0 }
 0x279   :  { %v922_v32 = vsel %vm914_vm3, %v921_v31, 0.0 }
 0x27a   :  { %923 = vadd.xlane.f32.xlu0 %v922_v32 }
 0x2ed   :  { %v924_v33 = vpop.xlane.xlu0 %923 }
 0x2ee   :  { %1380 = vlog2.f32 %v924_v33 }
 0x2f4   :  { %v1381_v34 = vpop.eup %1380 }
 0x2f5   :  { %v926_v35 = vmul.f32 0.6931472, %v1381_v34 }
 0x2f7   :  { %v927_v36 = vadd.f32 %v926_v35, %v917_v27 }
 0x2f9   :  { %v928_v37 = vsub.f32 %v907_v23, %v927_v36 }
 0x2fb   :  { %930 = vst.msk [vmem:[#allocation2] sm:$0x3] %vm929_vm4, %v928_v37 }
 0x2fc   :  { %941 = dma.vmem_to_hbm [thread:$0]  %s937_s26, 32, %s939_s29, [#allocation3]  }
 0x2fd   :  { %1406 = dma.done.wait [#allocation3], 32  }
 0x2fe   :  { %1407 = vsyncadd [#allocation3], 4294967264 }
 0x2ff   :  { %946 = vsyncpa [#allocation3], 1 }

</bundles_post_ra>
